<compile_context>
chip_gen: v5e
topology: v5e:2x2
jax: 0.10.0
libtpu: 0.0.40
codegen_flags: <defaults>
</compile_context>

<pallas_src>
import functools
import math

import jax
import jax.numpy as jnp
from jax.experimental import pallas as pl
from jax.experimental.pallas import tpu as pltpu

_LANE = 128
_TWO_PI = 2.0 * math.pi

# Per-grid-step block target. In + out, double buffered => ~4x this in VMEM
# (~16 MiB), which sits inside the recommended window for v5e (2-4 MiB blocks),
# v6e (3-6 MiB) and v7x (4-8 MiB) and stays well under v7x's 64 MiB physical VMEM.
_TARGET_BLOCK_BYTES = 4 << 20


def _bgr_to_hsv_kernel(x_ref, o_ref, *, eps: float):
    """Block: (NB, 3, TR, 128) flattened-pixel layout; channels ordered (B, G, R)."""
    x = x_ref[...]
    b = x[:, 0]
    g = x[:, 1]
    r = x[:, 2]

    maxc = jnp.maximum(jnp.maximum(r, g), b)
    minc = jnp.minimum(jnp.minimum(r, g), b)

    v = maxc
    deltac = maxc - minc

    # Exact division: this kernel is HBM-bound, the VPU has huge slack under the
    # DMA, so exact divides cost no wall-clock (and the approx recip broke accuracy).
    s = deltac / (v + eps)

    # Avoid div-by-zero; when deltac == 0 all channels are equal and h -> 0.
    dsafe = jnp.where(deltac == 0.0, jnp.ones_like(deltac), deltac)

    rc = maxc - r
    gc = maxc - g
    bc = maxc - b

    # kornia picks the FIRST channel (in RGB order) equal to the max.
    h = jnp.where(r == maxc, bc - gc,
                  jnp.where(g == maxc, 2.0 * dsafe + rc - bc,
                            4.0 * dsafe + gc - rc))
    h = ((h / dsafe) / 6.0) % 1.0
    h = h * _TWO_PI

    o_ref[:, 0] = h
    o_ref[:, 1] = s
    o_ref[:, 2] = v


def _pick_tr(rows: int, max_tr: int) -> int:
    """Rows-per-block: whole image if it fits; otherwise prefer a divisor of `rows`
    that is a multiple of 8 (every block full, no masked stores); else fall back to
    a ragged last block (grid via pl.cdiv, Pallas masks the OOB tail)."""
    if rows <= max_tr:
        return rows
    cand = max_tr - (max_tr % 8)
    for tr in range(cand, max(cand - 8 * 256, 511), -8):   # bounded host-side scan
        if rows % tr == 0:
            return tr
    return cand


def bgr_to_hsv(image: jax.Array, eps: float = 1e-8) -> jax.Array:
    """image: float [B, 3, H, W] in BGR, values in [0, 1]. Returns HSV [B, 3, H, W]."""
    B, C, H, W = image.shape
    assert C == 3, "expected 3-channel BGR input"
    dtype = image.dtype
    itemsize = jnp.dtype(dtype).itemsize

    # ---- lane-dense flattening: H*W -> (R rows, 128 lanes) -------------------
    HW = H * W
    R = pl.cdiv(HW, _LANE)
    HWp = R * _LANE

    x = image.reshape(B, 3, HW)                      # contiguous reshape: free
    if HWp != HW:
        # Only pad when H*W is not lane-aligned (unavoidable for lane density).
        x = jnp.pad(x, ((0, 0), (0, 0), (0, HWp - HW)))
    x = x.reshape(B, 3, R, _LANE)

    # ---- spatial tiling driven by a single target block size -----------------
    per_row_bytes = 3 * _LANE * itemsize
    max_tr = max(8, (_TARGET_BLOCK_BYTES // per_row_bytes) // 8 * 8)
    TR = _pick_tr(R, max_tr)

    # ---- batch packing: amortize the ~0.35us/step overhead for small images --
    block_bytes_one = 3 * TR * _LANE * itemsize
    nb_cap = max(1, _TARGET_BLOCK_BYTES // block_bytes_one)
    NB = max(d for d in range(1, B + 1) if B % d == 0 and d <= nb_cap)

    block_bytes = NB * block_bytes_one
    # in + out, double-buffered => ~4x block; keep explicit headroom, cap for v7x.
    vmem_limit = int(min(64 << 20, max(32 << 20, 5 * block_bytes)))

    kernel = functools.partial(_bgr_to_hsv_kernel, eps=eps)
    out = pl.pallas_call(
        kernel,
        out_shape=jax.ShapeDtypeStruct((B, 3, R, _LANE), dtype),
        grid=(B // NB, pl.cdiv(R, TR)),
        in_specs=[pl.BlockSpec((NB, 3, TR, _LANE), lambda i, j: (i, 0, j, 0))],
        out_specs=pl.BlockSpec((NB, 3, TR, _LANE), lambda i, j: (i, 0, j, 0)),
        compiler_params=pltpu.CompilerParams(
            dimension_semantics=("parallel", "parallel"),
            vmem_limit_bytes=vmem_limit,
        ),
    )(x)

    out = out.reshape(B, 3, HWp)
    if HWp != HW:
        out = out[:, :, :HW]
    return out.reshape(B, 3, H, W)


def _bgr_to_hsv_ref(image: jax.Array, eps: float = 1e-8) -> jax.Array:
    """Pure-JAX reference (kornia semantics) for sanity checking."""
    b, g, r = image[:, 0], image[:, 1], image[:, 2]
    maxc = jnp.maximum(jnp.maximum(r, g), b)
    minc = jnp.minimum(jnp.minimum(r, g), b)
    v = maxc
    deltac = maxc - minc
    s = deltac / (v + eps)
    dsafe = jnp.where(deltac == 0.0, 1.0, deltac)
    rc, gc, bc = maxc - r, maxc - g, maxc - b
    h = jnp.where(r == maxc, bc - gc,
                  jnp.where(g == maxc, 2.0 * dsafe + rc - bc,
                            4.0 * dsafe + gc - rc))
    h = ((h / dsafe) / 6.0) % 1.0 * _TWO_PI
    return jnp.stack([h, s, v], axis=1)


if __name__ == "__main__":
    key = jax.random.PRNGKey(0)
    B, C, H, W = 2, 3, 16, 16
    x = jax.random.uniform(key, (B, C, H, W), dtype=jnp.float32)  # BGR in [0, 1]

    out = jax.block_until_ready(bgr_to_hsv(x))
    ref = _bgr_to_hsv_ref(x)

    assert out.shape == (B, 3, H, W)
    diff = jnp.abs(out - ref)
    # Hue lives on a circle of circumference 2*pi: compare it circularly so a
    # harmless last-ulp wrap at the 0 / 2*pi boundary cannot inflate the error.
    diff = diff.at[:, 0].set(jnp.minimum(diff[:, 0], _TWO_PI - diff[:, 0]))
    assert float(jnp.max(diff)) < 1e-5
    print("KERNEL_OK")
</pallas_src>

<mosaic_0001>
module attributes {stable_mosaic.version = 11 : i64} {
  func.func @_bgr_to_hsv_kernel(%arg0: i32, %arg1: i32, %arg2: memref<2x3x2x128xf32, #tpu.memory_space<vmem>>, %arg3: memref<2x3x2x128xf32, #tpu.memory_space<vmem>>) attributes {dimension_semantics = [#tpu.dimension_semantics<parallel>, #tpu.dimension_semantics<parallel>], iteration_bounds = array<i64: 1, 1>, scalar_prefetch = 0 : i64, scratch_operands = 0 : i64, tpu.core_type = #tpu.core_type<tc>, window_params = [{transform_indices = @transform_0, window_bounds = array<i64: 2, 3, 2, 128>}, {transform_indices = @transform_1, window_bounds = array<i64: 2, 3, 2, 128>}]} {
    %c0 = arith.constant 0 : index
    %c0_0 = arith.constant 0 : index
    %c0_1 = arith.constant 0 : index
    %c0_2 = arith.constant 0 : index
    %0 = vector.load %arg2[%c0, %c0_0, %c0_1, %c0_2] : memref<2x3x2x128xf32, #tpu.memory_space<vmem>>, vector<2x3x2x128xf32>
    %1 = vector.extract_strided_slice %0 {offsets = [0, 0, 0, 0], sizes = [2, 1, 2, 128], strides = [1, 1, 1, 1]} : vector<2x3x2x128xf32> to vector<2x1x2x128xf32>
    %2 = vector.shape_cast %1 : vector<2x1x2x128xf32> to vector<2x2x128xf32>
    %3 = vector.extract_strided_slice %0 {offsets = [0, 1, 0, 0], sizes = [2, 1, 2, 128], strides = [1, 1, 1, 1]} : vector<2x3x2x128xf32> to vector<2x1x2x128xf32>
    %4 = vector.shape_cast %3 : vector<2x1x2x128xf32> to vector<2x2x128xf32>
    %5 = vector.extract_strided_slice %0 {offsets = [0, 2, 0, 0], sizes = [2, 1, 2, 128], strides = [1, 1, 1, 1]} : vector<2x3x2x128xf32> to vector<2x1x2x128xf32>
    %6 = vector.shape_cast %5 : vector<2x1x2x128xf32> to vector<2x2x128xf32>
    %7 = arith.maximumf %6, %4 : vector<2x2x128xf32>
    %8 = arith.maximumf %7, %2 : vector<2x2x128xf32>
    %9 = arith.minimumf %6, %4 : vector<2x2x128xf32>
    %10 = arith.minimumf %9, %2 : vector<2x2x128xf32>
    %11 = arith.subf %8, %10 : vector<2x2x128xf32>
    %cst = arith.constant 9.99999993E-9 : f32
    %12 = vector.broadcast %cst : f32 to vector<2x2x128xf32>
    %13 = arith.addf %8, %12 : vector<2x2x128xf32>
    %14 = arith.divf %11, %13 : vector<2x2x128xf32>
    %cst_3 = arith.constant 0.000000e+00 : f32
    %15 = vector.broadcast %cst_3 : f32 to vector<2x2x128xf32>
    %16 = arith.cmpf oeq, %11, %15 : vector<2x2x128xf32>
    %cst_4 = arith.constant 1.000000e+00 : f32
    %17 = vector.broadcast %cst_4 : f32 to vector<2x2x128xf32>
    %18 = arith.select %16, %17, %11 : vector<2x2x128xi1>, vector<2x2x128xf32>
    %19 = arith.subf %8, %6 : vector<2x2x128xf32>
    %20 = arith.subf %8, %4 : vector<2x2x128xf32>
    %21 = arith.subf %8, %2 : vector<2x2x128xf32>
    %22 = arith.cmpf oeq, %6, %8 : vector<2x2x128xf32>
    %23 = arith.subf %21, %20 : vector<2x2x128xf32>
    %24 = arith.cmpf oeq, %4, %8 : vector<2x2x128xf32>
    %cst_5 = arith.constant 2.000000e+00 : f32
    %25 = vector.broadcast %cst_5 : f32 to vector<2x2x128xf32>
    %26 = arith.mulf %25, %18 : vector<2x2x128xf32>
    %27 = arith.addf %26, %19 : vector<2x2x128xf32>
    %28 = arith.subf %27, %21 : vector<2x2x128xf32>
    %cst_6 = arith.constant 4.000000e+00 : f32
    %29 = vector.broadcast %cst_6 : f32 to vector<2x2x128xf32>
    %30 = arith.mulf %29, %18 : vector<2x2x128xf32>
    %31 = arith.addf %30, %20 : vector<2x2x128xf32>
    %32 = arith.subf %31, %19 : vector<2x2x128xf32>
    %33 = arith.select %24, %28, %32 : vector<2x2x128xi1>, vector<2x2x128xf32>
    %34 = arith.select %22, %23, %33 : vector<2x2x128xi1>, vector<2x2x128xf32>
    %35 = arith.divf %34, %18 : vector<2x2x128xf32>
    %cst_7 = arith.constant 6.000000e+00 : f32
    %36 = vector.broadcast %cst_7 : f32 to vector<2x2x128xf32>
    %37 = arith.divf %35, %36 : vector<2x2x128xf32>
    %cst_8 = arith.constant 1.000000e+00 : f32
    %38 = vector.broadcast %cst_8 : f32 to vector<2x2x128xf32>
    %39 = arith.remf %37, %38 : vector<2x2x128xf32>
    %cst_9 = arith.constant 0.000000e+00 : f32
    %40 = vector.broadcast %cst_9 : f32 to vector<2x2x128xf32>
    %41 = arith.cmpf one, %39, %40 : vector<2x2x128xf32>
    %cst_10 = arith.constant 0.000000e+00 : f32
    %42 = vector.broadcast %cst_10 : f32 to vector<2x2x128xf32>
    %43 = arith.cmpf olt, %39, %42 : vector<2x2x128xf32>
    %cst_11 = arith.constant 0.000000e+00 : f32
    %44 = arith.cmpf olt, %cst_8, %cst_11 : f32
    %45 = vector.broadcast %44 : i1 to vector<2x2x128xi1>
    %46 = vector.broadcast %45 : vector<2x2x128xi1> to vector<2x2x128xi1>
    %47 = arith.xori %43, %46 : vector<2x2x128xi1>
    %48 = arith.andi %47, %41 : vector<2x2x128xi1>
    %49 = vector.broadcast %cst_8 : f32 to vector<2x2x128xf32>
    %50 = arith.addf %39, %49 : vector<2x2x128xf32>
    %51 = arith.select %48, %50, %39 : vector<2x2x128xi1>, vector<2x2x128xf32>
    %cst_12 = arith.constant 6.28318548 : f32
    %52 = vector.broadcast %cst_12 : f32 to vector<2x2x128xf32>
    %53 = arith.mulf %51, %52 : vector<2x2x128xf32>
    %c0_13 = arith.constant 0 : index
    %c0_14 = arith.constant 0 : index
    %c0_15 = arith.constant 0 : index
    %c0_16 = arith.constant 0 : index
    %54 = vector.load %arg3[%c0_13, %c0_14, %c0_15, %c0_16] : memref<2x3x2x128xf32, #tpu.memory_space<vmem>>, vector<2x1x2x128xf32>
    %55 = vector.shape_cast %54 : vector<2x1x2x128xf32> to vector<2x2x128xf32>
    %56 = vector.shape_cast %53 : vector<2x2x128xf32> to vector<2x1x2x128xf32>
    tpu.vector_store %arg3[%c0_13, %c0_14, %c0_15, %c0_16], %56 {strides = array<i32>} : memref<2x3x2x128xf32, #tpu.memory_space<vmem>>, vector<2x1x2x128xf32>,
    %c0_17 = arith.constant 0 : index
    %c1 = arith.constant 1 : index
    %c0_18 = arith.constant 0 : index
    %c0_19 = arith.constant 0 : index
    %57 = vector.load %arg3[%c0_17, %c1, %c0_18, %c0_19] : memref<2x3x2x128xf32, #tpu.memory_space<vmem>>, vector<2x1x2x128xf32>
    %58 = vector.shape_cast %57 : vector<2x1x2x128xf32> to vector<2x2x128xf32>
    %59 = vector.shape_cast %14 : vector<2x2x128xf32> to vector<2x1x2x128xf32>
    tpu.vector_store %arg3[%c0_17, %c1, %c0_18, %c0_19], %59 {strides = array<i32>} : memref<2x3x2x128xf32, #tpu.memory_space<vmem>>, vector<2x1x2x128xf32>,
    %c0_20 = arith.constant 0 : index
    %c2 = arith.constant 2 : index
    %c0_21 = arith.constant 0 : index
    %c0_22 = arith.constant 0 : index
    %60 = vector.load %arg3[%c0_20, %c2, %c0_21, %c0_22] : memref<2x3x2x128xf32, #tpu.memory_space<vmem>>, vector<2x1x2x128xf32>
    %61 = vector.shape_cast %60 : vector<2x1x2x128xf32> to vector<2x2x128xf32>
    %62 = vector.shape_cast %8 : vector<2x2x128xf32> to vector<2x1x2x128xf32>
    tpu.vector_store %arg3[%c0_20, %c2, %c0_21, %c0_22], %62 {strides = array<i32>} : memref<2x3x2x128xf32, #tpu.memory_space<vmem>>, vector<2x1x2x128xf32>,
    return
  }
  func.func @transform_0(%arg0: i32, %arg1: i32) -> (i32, i32, i32, i32) {
    %c0_i32 = arith.constant 0 : i32
    %c0_i32_0 = arith.constant 0 : i32
    %c0_i32_1 = arith.constant 0 : i32
    return %arg0, %c0_i32, %arg1, %c0_i32_0 : i32, i32, i32, i32
  }
  func.func @transform_1(%arg0: i32, %arg1: i32) -> (i32, i32, i32, i32) {
    %c0_i32 = arith.constant 0 : i32
    %c0_i32_0 = arith.constant 0 : i32
    %c0_i32_1 = arith.constant 0 : i32
    return %arg0, %c0_i32, %arg1, %c0_i32_0 : i32, i32, i32, i32
  }
}

</mosaic_0001>

<bundles_post_ra>
// kernel: tpu_custom_call.1
= control target key start
LH: loop header
LB: loop body
LE: loop exit
PB: predicated region body
PF: predicated region fallthrough
CT: control target
= control target key end

     0   :  { %6 = vsyncpa [#allocation3], 0  ;;  %s449_s0 = inlined_call_operand.hbm [shape: f32[2,3,2,128], index: 0, kind: input, shape index: {}]   ;;  %s450_s1 = inlined_call_operand.hbm [shape: f32[2,3,2,128], index: 1, kind: output, shape index: {}]  }
   0x1   :  { %7 = vsyncpa [#allocation4], 0  ;;  %s12_s8 = sshll.u32 %s449_s0, 4  ;;  %s283_s9 = smov [#allocation2]   ;;  %s13_s8 = int_to_ptr.hbm [resolvable:$true] %s12_s8 }
   0x2   :  { %s14_s10 = sshll.u32 %s283_s9, 4  ;;  %s284_s11 = smov 32   ;;  %s15_s10 = int_to_ptr.vmem [resolvable:$true] %s14_s10 }
   0x3   :  { %s285_s12 = smov 2  }
   0x4   :  { %20 = dma.hbm_to_vmem [thread:$0]  %s13_s8, 192, %s15_s10, [#allocation3], %s284_s11, %s284_s11, %s285_s12  }
   0x5   :  { %279 = dma.done.wait [#allocation3], 192  }
   0x6   :  { %280 = vsyncadd [#allocation3], 4294967104  ;;  %v286_v0 = vmov 6.0   ;;  %v25_v2 = vld [vmem:[#allocation2] sm:$0x3]  ;;  %v287_v7 = vmov 1.0  }
   0x7   :  { %219 = vrcp.f32 %v286_v0  ;;  %v307_v3 = vld [vmem:[#allocation2 + $0x2] sm:$0x3]  ;;  %v309_v4 = vld [vmem:[#allocation2 + $0x4] sm:$0x3]  ;;  %v315_v8 = vld [vmem:[#allocation2 + $0x8] sm:$0x3] }
   0x8   :  { %v31_v5 = vmax.f32 %v309_v4, %v307_v3  ;;  %v35_v6 = vmin.f32 %v309_v4, %v307_v3  ;;  %221 = vrcp.f32 %v287_v7  ;;  %v317_v9 = vld [vmem:[#allocation2 + $0xa] sm:$0x3]  ;;  %v28_v14 = vld [vmem:[#allocation2 + $0x6] sm:$0x3]  ;;  %s288_s0 = smov [#allocation5]   ;;  %s200_s16 = sshll.u32 %s450_s1, 4  ;;  %s201_s16 = int_to_ptr.hbm [resolvable:$true] %s200_s16 }
   0x9   :  { %v32_v13 = vmax.f32 %v317_v9, %v315_v8  ;;  %v36_v15 = vmin.f32 %v317_v9, %v315_v8  ;;  %s198_s13 = sshll.u32 %s288_s0, 4  ;;  %s199_s13 = int_to_ptr.vmem [resolvable:$true] %s198_s13 }
   0xa   :  { %v319_v10 = vmax.f32 %v31_v5, %v25_v2  ;;  %v37_v11 = vmin.f32 %v35_v6, %v25_v2 }
   0xb   :  { %v333_v19 = vmax.f32 %v32_v13, %v28_v14  ;;  %v38_v20 = vmin.f32 %v36_v15, %v28_v14 }
   0xc   :  { %v327_v16 = vsub.f32 %v319_v10, %v37_v11  ;;  %192 = vst [vmem:[#allocation5 + $0x4] sm:$0x3] %v319_v10  ;;  %v77_v22 = vsub.f32 %v319_v10, %v309_v4  ;;  %v79_v23 = vsub.f32 %v319_v10, %v307_v3  ;;  %v81_v29 = vsub.f32 %v319_v10, %v25_v2 }
   0xd   :  { %v305_v1 = vpop.eup %219  ;;  %193 = vst [vmem:[#allocation5 + $0xa] sm:$0x3] %v333_v19  ;;  %v343_v27 = vsub.f32 %v333_v19, %v38_v20  ;;  %v78_v33 = vsub.f32 %v333_v19, %v317_v9  ;;  %v356_v34 = vsub.f32 %v333_v19, %v315_v8  ;;  %v359_v35 = vadd.f32 1e-08, %v319_v10 }
   0xe   :  { %v136_v12 = vmul.f32 6.0, %v305_v1  ;;  %v330_v17 = vpop.eup %221  ;;  %vm73_vm0 = vcmp.eq.f32.partialorder %v327_v16, 0.0  ;;  %vm140_vm1 = vweird.f32 %v305_v1  ;;  %vm83_vm3 = vcmp.eq.f32.partialorder %v309_v4, %v319_v10 }
   0xf   :  { %v75_v21 = vsel %vm73_vm0, 1.0, %v327_v16  ;;  %v146_v26 = vsub.f32 1.0, %v330_v17  ;;  %vm74_vm2 = vcmp.eq.f32.partialorder %v343_v27, 0.0  ;;  %vm87_vm4 = vcmp.eq.f32.partialorder %v307_v3, %v319_v10 }
  0x10   :  { %v137_v18 = vsub.f32 1.0, %v136_v12  ;;  %v89_v24 = vmul.f32 2.0, %v75_v21  ;;  %v95_v25 = vmul.f32 4.0, %v75_v21  ;;  %223 = vrcp.f32 %v75_v21 }
  0x11   :  { %v350_v32 = vsel %vm74_vm2, 1.0, %v343_v27  ;;  %v147_v36 = vmul.f32 %v330_v17, %v146_v26  ;;  %v114_v40 = vand.u32 2147483647, %v75_v21  ;;  %v116_v45 = vand.u32 2147483648, %v75_v21 }
  0x12   :  { %v138_v28 = vmul.f32 %v305_v1, %v137_v18  ;;  %v91_v30 = vadd.f32 %v89_v24, %v77_v22  ;;  %v97_v31 = vadd.f32 %v95_v25, %v79_v23  ;;  %v90_v37 = vmul.f32 2.0, %v350_v32 }
  0x13   :  { %v96_v38 = vmul.f32 4.0, %v350_v32  ;;  %225 = vrcp.f32 %v350_v32  ;;  %vm149_vm5 = vweird.f32 %v330_v17  ;;  %v82_v46 = vsub.f32 %v333_v19, %v28_v14 }
  0x14   :  { %v139_v41 = vadd.f32 %v305_v1, %v138_v28  ;;  %v93_v42 = vsub.f32 %v91_v30, %v81_v29  ;;  %v99_v43 = vsub.f32 %v97_v31, %v77_v22  ;;  %v92_v47 = vadd.f32 %v90_v37, %v78_v33 }
  0x15   :  { %v98_v48 = vadd.f32 %v96_v38, %v356_v34  ;;  %227 = vrcp.f32 %v359_v35  ;;  %vm110_vm6 = vweird.f32 %v75_v21  ;;  %v148_v50 = vadd.f32 %v330_v17, %v147_v36 }
  0x16   :  { %v224_v39 = vpop.eup %223  ;;  %v85_v51 = vsub.f32 %v81_v29, %v79_v23  ;;  %vm375_vm8 = vcmp.eq.f32.partialorder %v114_v40, 8.507059e+37  ;;  %v141_v53 = vsel %vm140_vm1, %v305_v1, %v139_v41  ;;  %v383_v54 = vadd.f32 1e-08, %v333_v19 }
  0x17   :  { %v106_v44 = vmul.f32 %v224_v39, %v75_v21  ;;  %vm111_vm7 = vweird.f32 %v224_v39  ;;  %v101_v55 = vsel %vm87_vm4, %v93_v42, %v99_v43  ;;  %v117_v57 = vor.u32 1.1754944e-38, %v116_v45 }
  0x18   :  { %vm84_vm9 = vcmp.eq.f32.partialorder %v317_v9, %v333_v19  ;;  %vm390_vm10 = vmor %vm110_vm6, %vm111_vm7  ;;  %v86_v60 = vsub.f32 %v82_v46, %v356_v34  ;;  %v94_v61 = vsub.f32 %v92_v47, %v82_v46  ;;  %v100_v62 = vsub.f32 %v98_v48, %v78_v33 }
  0x19   :  { %v107_v49 = vsub.f32 1.0, %v106_v44  ;;  %v226_v58 = vpop.eup %225  ;;  %229 = vrcp.f32 %v383_v54  ;;  %vm88_vm11 = vcmp.eq.f32.partialorder %v315_v8, %v333_v19  ;;  %vm125_vm12 = vweird.f32 %v350_v32 }
  0x1a   :  { %v121_v0 = vmul.f32 %v226_v58, %v350_v32  ;;  %v103_v2 = vsel %vm83_vm3, %v85_v51, %v101_v55  ;;  %v129_v3 = vand.u32 2147483647, %v350_v32  ;;  %v131_v5 = vand.u32 2147483648, %v350_v32 }
  0x1b   :  { %v108_v56 = vmul.f32 %v224_v39, %v107_v49  ;;  %v228_v1 = vpop.eup %227  ;;  %vm48_vm13 = vweird.f32 %v359_v35  ;;  %vm126_vm14 = vweird.f32 %v226_v58  ;;  %v102_v12 = vsel %vm88_vm11, %v94_v61, %v100_v62 }
  0x1c   :  { %v122_v7 = vsub.f32 1.0, %v121_v0  ;;  %v44_v8 = vmul.f32 %v228_v1, %v359_v35  ;;  %v52_v4 = vand.u32 2147483647, %v359_v35  ;;  %v54_v10 = vand.u32 2147483648, %v359_v35  ;;  %vm418_vm0 = vmor %vm125_vm12, %vm126_vm14 }
  0x1d   :  { %v109_v63 = vadd.f32 %v224_v39, %v108_v56  ;;  %vm49_vm15 = vweird.f32 %v228_v1  ;;  %v150_v20 = vsel %vm149_vm5, %v330_v17, %v148_v50  ;;  %vm130_vm1 = vcmp.eq.f32.partialorder %v129_v3, 8.507059e+37 }
  0x1e   :  { %v123_v14 = vmul.f32 %v226_v58, %v122_v7  ;;  %v45_v15 = vsub.f32 1.0, %v44_v8  ;;  %v132_v22 = vor.u32 1.1754944e-38, %v131_v5  ;;  %v104_v28 = vsel %vm84_vm9, %v86_v60, %v102_v12  ;;  %vm428_vm2 = vmor %vm48_vm13, %vm49_vm15 }
  0x1f   :  { %v113_v6 = vsel %vm390_vm10, %v224_v39, %v109_v63  ;;  %v230_v18 = vpop.eup %229  ;;  %vm53_vm3 = vcmp.eq.f32.partialorder %v52_v4, 8.507059e+37  ;;  %v55_v29 = vor.u32 1.1754944e-38, %v54_v10  ;;  %vm63_vm4 = vweird.f32 %v383_v54 }
  0x20   :  { %v118_v11 = vsel %vm375_vm8, %v117_v57, %v113_v6  ;;  %v124_v24 = vadd.f32 %v226_v58, %v123_v14  ;;  %v46_v25 = vmul.f32 %v228_v1, %v45_v15  ;;  %v59_v26 = vmul.f32 %v230_v18, %v383_v54 }
  0x21   :  { %v119_v13 = vmul.f32 %v118_v11, %v103_v2  ;;  %v69_v33 = vand.u32 2147483648, %v383_v54  ;;  %vm64_vm5 = vweird.f32 %v230_v18  ;;  %v67_v19 = vand.u32 2147483647, %v383_v54 }
  0x22   :  { %v128_v31 = vsel %vm418_vm0, %v226_v58, %v124_v24  ;;  %v47_v32 = vadd.f32 %v228_v1, %v46_v25  ;;  %v60_v9 = vsub.f32 1.0, %v59_v26  ;;  %vm65_vm6 = vmor %vm63_vm4, %vm64_vm5 }
  0x23   :  { %v142_v23 = vmul.f32 %v141_v53, %v119_v13  ;;  %v133_v34 = vsel %vm130_vm1, %v132_v22, %v128_v31  ;;  %v70_v43 = vor.u32 1.1754944e-38, %v69_v33  ;;  %vm68_vm7 = vcmp.eq.f32.partialorder %v67_v19, 8.507059e+37 }
  0x24   :  { %v134_v36 = vmul.f32 %v133_v34, %v104_v28  ;;  %v51_v37 = vsel %vm428_vm2, %v228_v1, %v47_v32  ;;  %v61_v39 = vmul.f32 %v230_v18, %v60_v9 }
  0x25   :  { %v144_v30 = vand.u32 2147483647, %v142_v23  ;;  %v56_v38 = vsel %vm53_vm3, %v55_v29, %v51_v37  ;;  %v157_v48 = vand.u32 2147483648, %v142_v23 }
  0x26   :  { %v143_v41 = vmul.f32 %v141_v53, %v134_v36  ;;  %v57_v42 = vmul.f32 %v56_v38, %v327_v16  ;;  %v62_v44 = vadd.f32 %v230_v18, %v61_v39 }
  0x27   :  { %v151_v35 = vmul.f32 %v150_v20, %v144_v30 }
  0x28   :  { %v159_v46 = vand.u32 2147483647, %v143_v41  ;;  %189 = vst [vmem:[#allocation5 + $0x2] sm:$0x3] %v57_v42  ;;  %v66_v47 = vsel %vm65_vm6, %v230_v18, %v62_v44  ;;  %v172_v56 = vand.u32 2147483648, %v143_v41 }
  0x29   :  { %v152_v40 = vfloor.f32 %v151_v35  ;;  %v71_v50 = vsel %vm68_vm7, %v70_v43, %v66_v47 }
  0x2a   :  { %v166_v49 = vmul.f32 %v159_v46, %v150_v20  ;;  %v72_v52 = vmul.f32 %v71_v50, %v343_v27 }
  0x2b   :  { %v153_v45 = vsub.f32 %v144_v30, %v152_v40 }
  0x2c   :  { %v167_v55 = vfloor.f32 %v166_v49  ;;  %190 = vst [vmem:[#allocation5 + $0x8] sm:$0x3] %v72_v52 }
  0x2d   :  { %vm154_vm8 = vcmp.eq.f32.partialorder %v153_v45, 1.0 }
  0x2e   :  { %v155_v51 = vsel %vm154_vm8, 0.0, %v153_v45  ;;  %v168_v54 = vsub.f32 %v159_v46, %v167_v55 }
  0x2f   :  { %v156_v53 = vand.u32 2147483647, %v155_v51 }
  0x30   :  { %vm169_vm11 = vcmp.eq.f32.partialorder %v168_v54, 1.0 }
  0x31   :  { %v158_v16 = vor.u32 %v157_v48, %v156_v53  ;;  %v170_v58 = vsel %vm169_vm11, 0.0, %v168_v54 }
  0x32   :  { %v171_v60 = vand.u32 2147483647, %v170_v58 }
  0x33   :  { %vm174_vm9 = vcmp.ne.f32.partialorder %v158_v16, 0.0  ;;  %vm176_vm10 = vcmp.lt.f32.partialorder %v158_v16, 0.0  ;;  %v180_v57 = vadd.f32 1.0, %v158_v16 }
  0x34   :  { %vm178_vm12 = vmand %vm176_vm10, %vm174_vm9  ;;  %v173_v62 = vor.u32 %v172_v56, %v171_v60 }
  0x35   :  { %v182_v59 = vsel %vm178_vm12, %v180_v57, %v158_v16 }
  0x36   :  { %v184_v61 = vmul.f32 6.2831855, %v182_v59  ;;  %vm175_vm13 = vcmp.ne.f32.partialorder %v173_v62, 0.0  ;;  %vm177_vm14 = vcmp.lt.f32.partialorder %v173_v62, 0.0  ;;  %v181_v27 = vadd.f32 1.0, %v173_v62 }
  0x37   :  { %vm179_vm15 = vmand %vm177_vm14, %vm175_vm13 }
  0x38   :  { %186 = vst [vmem:[#allocation5] sm:$0x3] %v184_v61  ;;  %v183_v63 = vsel %vm179_vm15, %v181_v27, %v173_v62 }
  0x39   :  { %v185_v0 = vmul.f32 6.2831855, %v183_v63 }
  0x3b   :  { %187 = vst [vmem:[#allocation5 + $0x6] sm:$0x3] %v185_v0 }
  0x3c   :  { %206 = dma.vmem_to_hbm [thread:$0]  %s199_s13, 192, %s201_s16, [#allocation4], %s284_s11, %s284_s11, %s285_s12  }
  0x3d   :  { %281 = dma.done.wait [#allocation4], 192  }
  0x3e   :  { %282 = vsyncadd [#allocation4], 4294967104 }
  0x3f   :  { %211 = vsyncpa [#allocation3], 1 }
  0x40   :  { %212 = vsyncpa [#allocation4], 1 }

</bundles_post_ra>
